<compile_context>
chip_gen: v5e
topology: v5e:2x2
jax: 0.10.0
libtpu: 0.0.40
codegen_flags: <defaults>
</compile_context>

<pallas_src>
import jax
import jax.numpy as jnp
from jax.experimental import pallas as pl
from jax.experimental.pallas import tpu as pltpu


def _make_gather_kernel(rows_per_step: int, chunk_rows: int):
    """Build a kernel that gathers `rows_per_step` HBM rows per grid step."""
    G = int(rows_per_step)
    CH = max(1, min(int(chunk_rows), G))

    # Static chunk schedule within one step: [(offset_in_step, length), ...]
    chunks = []
    off = 0
    while off < G:
        ln = min(CH, G - off)
        chunks.append((off, ln))
        off += ln
    n_chunks = len(chunks)

    def kernel(idx_ref, imgs_hbm, out_hbm, sem):
        # idx_ref  : (M_pad,) int32 scalar-prefetched row indices (SMEM)
        # imgs_hbm : (N, D) dataset, raw HBM ref (memory_space=pl.ANY)
        # out_hbm  : (M_pad, D) output, raw HBM ref (memory_space=pl.ANY)
        # sem      : (2,) DMA semaphores; chunks alternate between the two.
        step = pl.program_id(0)
        base = step * G

        def wait_chunk(c):
            coff, cln = chunks[c]
            dst = out_hbm.at[pl.ds(base + coff, cln)]
            # A wait only uses the destination size + semaphore; build the
            # descriptor against the chunk's real destination slab (not a
            # mismatched placeholder) so it stays valid for any N.
            pltpu.make_async_copy(dst, dst, sem.at[c % 2]).wait()

        for c, (coff, cln) in enumerate(chunks):
            csem = sem.at[c % 2]
            # Issue cln row-gather DMAs back-to-back; all signal this chunk's
            # semaphore, so one chunk-sized wait consumes them all.  Scalar
            # SMEM index reads happen before any wait (keeps sst->sld
            # forwarding intact).
            for g in range(cln):
                dst_row = base + coff + g
                src_row = idx_ref[dst_row]
                pltpu.make_async_copy(
                    imgs_hbm.at[pl.ds(src_row, 1)],
                    out_hbm.at[pl.ds(dst_row, 1)],
                    csem,
                ).start()
            # Overlap: only after this chunk's descriptors are in flight do we
            # wait for the previous chunk (bounds in-flight DMAs to 2 chunks).
            if c >= 1:
                wait_chunk(c - 1)

        # Drain the last chunk: the step is fully self-contained, which is
        # what makes the grid axis safe to mark "parallel" (v7x megacore).
        wait_chunk(n_chunks - 1)

    return kernel


def gather_images_pallas(images_all: jax.Array,
                         flat_indices: jax.Array,
                         *,
                         rows_per_step: int | None = None,
                         chunk_rows: int = 32) -> jax.Array:
    """Gather images_all[flat_indices] along axis 0 with a Pallas kernel.

    images_all:   (N, C, H, W) (any leading-axis-indexable image tensor)
    flat_indices: (M,) integer indices (clamped to [0, N) to avoid OOB DMA)
    returns:      (M, C, H, W)
    """
    feat_shape = tuple(int(d) for d in images_all.shape[1:])
    N = int(images_all.shape[0])
    D = 1
    for d in feat_shape:
        D *= int(d)
    imgs_flat = images_all.reshape(N, D)  # free layout plumbing: contiguous rows

    M = int(flat_indices.shape[0])
    itemsize = jnp.dtype(images_all.dtype).itemsize
    row_bytes = D * itemsize

    if rows_per_step is None:
        # Target ~1.5 MiB gathered per grid step (amortizes fixed per-step
        # overhead, keeps the DMA engines saturated), capped at 256 rows to
        # bound the unrolled descriptor-issue code size.
        target = -(-(3 * 512 * 1024) // row_bytes)
        G = max(1, min(target, 256, M))
        if M % G != 0:
            # Prefer a divisor of M so the common path has no padded tail and
            # no wrapper-side [:M] copy pass over the gathered tensor.
            for cand in range(G, max(1, G // 2) - 1, -1):
                if M % cand == 0:
                    G = cand
                    break
    else:
        G = max(1, min(int(rows_per_step), M))

    n_steps = -(-M // G)
    M_pad = n_steps * G

    # Clamp indices: an out-of-range index would issue an OOB DMA.
    idx = jnp.clip(flat_indices.astype(jnp.int32), 0, N - 1)
    if M_pad != M:
        # Pad with a valid row index; padded output rows are dropped below.
        idx = jnp.concatenate([idx, jnp.zeros((M_pad - M,), jnp.int32)])

    kernel = _make_gather_kernel(G, chunk_rows)

    grid_spec = pltpu.PrefetchScalarGridSpec(
        num_scalar_prefetch=1,
        grid=(n_steps,),
        in_specs=[pl.BlockSpec(memory_space=pl.ANY)],     # dataset stays in HBM
        out_specs=pl.BlockSpec(memory_space=pl.ANY),      # gather writes HBM directly
        scratch_shapes=[pltpu.SemaphoreType.DMA((2,))],   # one sem per in-flight chunk
    )

    out_flat = pl.pallas_call(
        kernel,
        grid_spec=grid_spec,
        out_shape=jax.ShapeDtypeStruct((M_pad, D), images_all.dtype),
        compiler_params=pltpu.CompilerParams(
            # Steps are self-contained => safe to split the grid across
            # TensorCores (2x descriptor-issue rate on v7x; no-op on v5e/v6e).
            dimension_semantics=("parallel",),
        ),
    )(idx, imgs_flat)

    if M_pad != M:
        out_flat = out_flat[:M]  # only on the rare ragged path
    return out_flat.reshape((M,) + feat_shape)


class NetPallas:
    """JAX/Pallas port of compressors/dset.py::Net (forward pass only)."""

    def __init__(self, dset, num_classes, batch_size):
        self.name = "dset"
        self.images_all, self.indices_class = dset  # indices_class: list of int32 arrays
        self.num_classes = num_classes
        self.batch_size = batch_size

    def _sample_indices(self, key, cls, batch_size):
        # Deterministic stand-in for get_images()' random per-class selection.
        idx_c = self.indices_class[cls]
        perm = jax.random.permutation(jax.random.fold_in(key, cls), idx_c.shape[0])
        return idx_c[perm[:batch_size]]

    def _select_indices(self, key, classes, batch_size):
        return jnp.concatenate(
            [self._sample_indices(key, c, batch_size) for c in classes], axis=0
        ).astype(jnp.int32)

    def forward(self, key, task_indices=None, cls=None, new_batch_size=None):
        batch_size = self.batch_size if new_batch_size is None else new_batch_size
        if cls is not None:
            assert task_indices is None
            classes = [cls]
        elif task_indices is not None:
            classes = list(task_indices)
        else:
            classes = list(range(self.num_classes))

        # Per-class index selection (glue), then one fused Pallas gather.
        flat_indices = self._select_indices(key, classes, batch_size)
        real_imgs = gather_images_pallas(self.images_all, flat_indices)
        # TODO(synk): torch.long labels are represented as int32 (class ids are small).
        real_labs = jnp.repeat(jnp.asarray(classes, dtype=jnp.int32), batch_size)
        return real_imgs, real_labs


if __name__ == "__main__":
    key = jax.random.PRNGKey(0)

    # Small synthetic dataset consistent with the module's expectations.
    num_classes = 4
    per_class = 16
    batch_size = 4
    C, H, W = 4, 16, 16
    N = num_classes * per_class

    k_img, k_sample, k_extra = jax.random.split(key, 3)
    images_all = jax.random.normal(k_img, (N, C, H, W), dtype=jnp.float32)
    labels_all = jnp.arange(N, dtype=jnp.int32) % num_classes
    indices_class = [
        jnp.where(labels_all == c)[0].astype(jnp.int32) for c in range(num_classes)
    ]

    net = NetPallas((images_all, indices_class), num_classes, batch_size)

    # --- default branch: all classes, batch_size each ----------------------
    real_imgs, real_labs = net.forward(k_sample)
    jax.block_until_ready((real_imgs, real_labs))
    flat_idx = net._select_indices(k_sample, list(range(num_classes)), batch_size)
    ref_imgs = jnp.take(images_all, flat_idx, axis=0)
    ref_labs = jnp.repeat(jnp.arange(num_classes, dtype=jnp.int32), batch_size)
    assert real_imgs.shape == (num_classes * batch_size, C, H, W)
    assert real_labs.shape == (num_classes * batch_size,)
    assert jnp.allclose(real_imgs, ref_imgs)
    assert jnp.array_equal(real_labs, ref_labs)

    # --- cls branch (single class, new_batch_size) --------------------------
    cls_imgs, cls_labs = net.forward(k_sample, cls=2, new_batch_size=3)
    jax.block_until_ready((cls_imgs, cls_labs))
    cls_idx = net._select_indices(k_sample, [2], 3)
    assert jnp.allclose(cls_imgs, jnp.take(images_all, cls_idx, axis=0))
    assert jnp.array_equal(cls_labs, jnp.full((3,), 2, jnp.int32))

    # --- task_indices branch -------------------------------------------------
    ti_imgs, ti_labs = net.forward(k_sample, task_indices=[1, 3])
    jax.block_until_ready((ti_imgs, ti_labs))
    ti_idx = net._select_indices(k_sample, [1, 3], batch_size)
    assert jnp.allclose(ti_imgs, jnp.take(images_all, ti_idx, axis=0))
    assert jnp.array_equal(
        ti_labs, jnp.repeat(jnp.asarray([1, 3], jnp.int32), batch_size))

    # --- exercise multi-step grid, multi-chunk issue, padded-tail path ------
    rand_idx = jax.random.randint(k_extra, (20,), 0, N, dtype=jnp.int32)  # 20 % 8 != 0
    gathered = gather_images_pallas(images_all, rand_idx, rows_per_step=8, chunk_rows=4)
    jax.block_until_ready(gathered)
    assert jnp.allclose(gathered, jnp.take(images_all, rand_idx, axis=0))

    print("KERNEL_OK")
</pallas_src>

<mosaic_0001>
module attributes {stable_mosaic.version = 11 : i64} {
  func.func @kernel(%arg0: i32, %arg1: memref<16xi32, #tpu.memory_space<smem>>, %arg2: memref<64x1024xf32, #tpu.memory_space<any>>, %arg3: memref<16x1024xf32, #tpu.memory_space<any>>, %arg4: memref<2x!tpu.dma_semaphore, #tpu.memory_space<semaphore_mem>>) attributes {dimension_semantics = [#tpu.dimension_semantics<parallel>], iteration_bounds = array<i64: 1>, scalar_prefetch = 1 : i64, scratch_operands = 1 : i64, tpu.core_type = #tpu.core_type<tc>, window_params = [{}, {}]} {
    %c16_i32 = arith.constant 16 : i32
    %0 = arith.muli %arg0, %c16_i32 : i32
    %c0_i32 = arith.constant 0 : i32
    %1 = arith.addi %0, %c0_i32 : i32
    %c0_i32_0 = arith.constant 0 : i32
    %2 = arith.addi %1, %c0_i32_0 : i32
    %3 = arith.index_cast %2 : i32 to index
    %4 = memref.load %arg1[%3] : memref<16xi32, #tpu.memory_space<smem>>
    %c0_i32_1 = arith.constant 0 : i32
    %c0_i32_2 = arith.constant 0 : i32
    %5 = tpu.memref_slice %arg2[%4, %c0_i32_2] : memref<64x1024xf32, #tpu.memory_space<any>> -> memref<1x1024xf32, #tpu.memory_space<any>>
    %c0_i32_3 = arith.constant 0 : i32
    %6 = tpu.memref_slice %arg3[%2, %c0_i32_3] : memref<16x1024xf32, #tpu.memory_space<any>> -> memref<1x1024xf32, #tpu.memory_space<any>>
    %7 = tpu.memref_slice %arg4[%c0_i32_1] : memref<2x!tpu.dma_semaphore, #tpu.memory_space<semaphore_mem>> -> memref<1x!tpu.dma_semaphore, #tpu.memory_space<semaphore_mem>>
    %8 = tpu.memref_squeeze %7 : memref<1x!tpu.dma_semaphore, #tpu.memory_space<semaphore_mem>> -> memref<!tpu.dma_semaphore, #tpu.memory_space<semaphore_mem>>
    tpu.enqueue_dma source(%5 : memref<1x1024xf32, #tpu.memory_space<any>>) target(%6 : memref<1x1024xf32, #tpu.memory_space<any>>) target_semaphore(%8 : memref<!tpu.dma_semaphore, #tpu.memory_space<semaphore_mem>>)
    %c0_i32_4 = arith.constant 0 : i32
    %9 = arith.addi %0, %c0_i32_4 : i32
    %c1_i32 = arith.constant 1 : i32
    %10 = arith.addi %9, %c1_i32 : i32
    %11 = arith.index_cast %10 : i32 to index
    %12 = memref.load %arg1[%11] : memref<16xi32, #tpu.memory_space<smem>>
    %c0_i32_5 = arith.constant 0 : i32
    %c0_i32_6 = arith.constant 0 : i32
    %13 = tpu.memref_slice %arg2[%12, %c0_i32_6] : memref<64x1024xf32, #tpu.memory_space<any>> -> memref<1x1024xf32, #tpu.memory_space<any>>
    %c0_i32_7 = arith.constant 0 : i32
    %14 = tpu.memref_slice %arg3[%10, %c0_i32_7] : memref<16x1024xf32, #tpu.memory_space<any>> -> memref<1x1024xf32, #tpu.memory_space<any>>
    %15 = tpu.memref_slice %arg4[%c0_i32_5] : memref<2x!tpu.dma_semaphore, #tpu.memory_space<semaphore_mem>> -> memref<1x!tpu.dma_semaphore, #tpu.memory_space<semaphore_mem>>
    %16 = tpu.memref_squeeze %15 : memref<1x!tpu.dma_semaphore, #tpu.memory_space<semaphore_mem>> -> memref<!tpu.dma_semaphore, #tpu.memory_space<semaphore_mem>>
    tpu.enqueue_dma source(%13 : memref<1x1024xf32, #tpu.memory_space<any>>) target(%14 : memref<1x1024xf32, #tpu.memory_space<any>>) target_semaphore(%16 : memref<!tpu.dma_semaphore, #tpu.memory_space<semaphore_mem>>)
    %c0_i32_8 = arith.constant 0 : i32
    %17 = arith.addi %0, %c0_i32_8 : i32
    %c2_i32 = arith.constant 2 : i32
    %18 = arith.addi %17, %c2_i32 : i32
    %19 = arith.index_cast %18 : i32 to index
    %20 = memref.load %arg1[%19] : memref<16xi32, #tpu.memory_space<smem>>
    %c0_i32_9 = arith.constant 0 : i32
    %c0_i32_10 = arith.constant 0 : i32
    %21 = tpu.memref_slice %arg2[%20, %c0_i32_10] : memref<64x1024xf32, #tpu.memory_space<any>> -> memref<1x1024xf32, #tpu.memory_space<any>>
    %c0_i32_11 = arith.constant 0 : i32
    %22 = tpu.memref_slice %arg3[%18, %c0_i32_11] : memref<16x1024xf32, #tpu.memory_space<any>> -> memref<1x1024xf32, #tpu.memory_space<any>>
    %23 = tpu.memref_slice %arg4[%c0_i32_9] : memref<2x!tpu.dma_semaphore, #tpu.memory_space<semaphore_mem>> -> memref<1x!tpu.dma_semaphore, #tpu.memory_space<semaphore_mem>>
    %24 = tpu.memref_squeeze %23 : memref<1x!tpu.dma_semaphore, #tpu.memory_space<semaphore_mem>> -> memref<!tpu.dma_semaphore, #tpu.memory_space<semaphore_mem>>
    tpu.enqueue_dma source(%21 : memref<1x1024xf32, #tpu.memory_space<any>>) target(%22 : memref<1x1024xf32, #tpu.memory_space<any>>) target_semaphore(%24 : memref<!tpu.dma_semaphore, #tpu.memory_space<semaphore_mem>>)
    %c0_i32_12 = arith.constant 0 : i32
    %25 = arith.addi %0, %c0_i32_12 : i32
    %c3_i32 = arith.constant 3 : i32
    %26 = arith.addi %25, %c3_i32 : i32
    %27 = arith.index_cast %26 : i32 to index
    %28 = memref.load %arg1[%27] : memref<16xi32, #tpu.memory_space<smem>>
    %c0_i32_13 = arith.constant 0 : i32
    %c0_i32_14 = arith.constant 0 : i32
    %29 = tpu.memref_slice %arg2[%28, %c0_i32_14] : memref<64x1024xf32, #tpu.memory_space<any>> -> memref<1x1024xf32, #tpu.memory_space<any>>
    %c0_i32_15 = arith.constant 0 : i32
    %30 = tpu.memref_slice %arg3[%26, %c0_i32_15] : memref<16x1024xf32, #tpu.memory_space<any>> -> memref<1x1024xf32, #tpu.memory_space<any>>
    %31 = tpu.memref_slice %arg4[%c0_i32_13] : memref<2x!tpu.dma_semaphore, #tpu.memory_space<semaphore_mem>> -> memref<1x!tpu.dma_semaphore, #tpu.memory_space<semaphore_mem>>
    %32 = tpu.memref_squeeze %31 : memref<1x!tpu.dma_semaphore, #tpu.memory_space<semaphore_mem>> -> memref<!tpu.dma_semaphore, #tpu.memory_space<semaphore_mem>>
    tpu.enqueue_dma source(%29 : memref<1x1024xf32, #tpu.memory_space<any>>) target(%30 : memref<1x1024xf32, #tpu.memory_space<any>>) target_semaphore(%32 : memref<!tpu.dma_semaphore, #tpu.memory_space<semaphore_mem>>)
    %c0_i32_16 = arith.constant 0 : i32
    %33 = arith.addi %0, %c0_i32_16 : i32
    %c4_i32 = arith.constant 4 : i32
    %34 = arith.addi %33, %c4_i32 : i32
    %35 = arith.index_cast %34 : i32 to index
    %36 = memref.load %arg1[%35] : memref<16xi32, #tpu.memory_space<smem>>
    %c0_i32_17 = arith.constant 0 : i32
    %c0_i32_18 = arith.constant 0 : i32
    %37 = tpu.memref_slice %arg2[%36, %c0_i32_18] : memref<64x1024xf32, #tpu.memory_space<any>> -> memref<1x1024xf32, #tpu.memory_space<any>>
    %c0_i32_19 = arith.constant 0 : i32
    %38 = tpu.memref_slice %arg3[%34, %c0_i32_19] : memref<16x1024xf32, #tpu.memory_space<any>> -> memref<1x1024xf32, #tpu.memory_space<any>>
    %39 = tpu.memref_slice %arg4[%c0_i32_17] : memref<2x!tpu.dma_semaphore, #tpu.memory_space<semaphore_mem>> -> memref<1x!tpu.dma_semaphore, #tpu.memory_space<semaphore_mem>>
    %40 = tpu.memref_squeeze %39 : memref<1x!tpu.dma_semaphore, #tpu.memory_space<semaphore_mem>> -> memref<!tpu.dma_semaphore, #tpu.memory_space<semaphore_mem>>
    tpu.enqueue_dma source(%37 : memref<1x1024xf32, #tpu.memory_space<any>>) target(%38 : memref<1x1024xf32, #tpu.memory_space<any>>) target_semaphore(%40 : memref<!tpu.dma_semaphore, #tpu.memory_space<semaphore_mem>>)
    %c0_i32_20 = arith.constant 0 : i32
    %41 = arith.addi %0, %c0_i32_20 : i32
    %c5_i32 = arith.constant 5 : i32
    %42 = arith.addi %41, %c5_i32 : i32
    %43 = arith.index_cast %42 : i32 to index
    %44 = memref.load %arg1[%43] : memref<16xi32, #tpu.memory_space<smem>>
    %c0_i32_21 = arith.constant 0 : i32
    %c0_i32_22 = arith.constant 0 : i32
    %45 = tpu.memref_slice %arg2[%44, %c0_i32_22] : memref<64x1024xf32, #tpu.memory_space<any>> -> memref<1x1024xf32, #tpu.memory_space<any>>
    %c0_i32_23 = arith.constant 0 : i32
    %46 = tpu.memref_slice %arg3[%42, %c0_i32_23] : memref<16x1024xf32, #tpu.memory_space<any>> -> memref<1x1024xf32, #tpu.memory_space<any>>
    %47 = tpu.memref_slice %arg4[%c0_i32_21] : memref<2x!tpu.dma_semaphore, #tpu.memory_space<semaphore_mem>> -> memref<1x!tpu.dma_semaphore, #tpu.memory_space<semaphore_mem>>
    %48 = tpu.memref_squeeze %47 : memref<1x!tpu.dma_semaphore, #tpu.memory_space<semaphore_mem>> -> memref<!tpu.dma_semaphore, #tpu.memory_space<semaphore_mem>>
    tpu.enqueue_dma source(%45 : memref<1x1024xf32, #tpu.memory_space<any>>) target(%46 : memref<1x1024xf32, #tpu.memory_space<any>>) target_semaphore(%48 : memref<!tpu.dma_semaphore, #tpu.memory_space<semaphore_mem>>)
    %c0_i32_24 = arith.constant 0 : i32
    %49 = arith.addi %0, %c0_i32_24 : i32
    %c6_i32 = arith.constant 6 : i32
    %50 = arith.addi %49, %c6_i32 : i32
    %51 = arith.index_cast %50 : i32 to index
    %52 = memref.load %arg1[%51] : memref<16xi32, #tpu.memory_space<smem>>
    %c0_i32_25 = arith.constant 0 : i32
    %c0_i32_26 = arith.constant 0 : i32
    %53 = tpu.memref_slice %arg2[%52, %c0_i32_26] : memref<64x1024xf32, #tpu.memory_space<any>> -> memref<1x1024xf32, #tpu.memory_space<any>>
    %c0_i32_27 = arith.constant 0 : i32
    %54 = tpu.memref_slice %arg3[%50, %c0_i32_27] : memref<16x1024xf32, #tpu.memory_space<any>> -> memref<1x1024xf32, #tpu.memory_space<any>>
    %55 = tpu.memref_slice %arg4[%c0_i32_25] : memref<2x!tpu.dma_semaphore, #tpu.memory_space<semaphore_mem>> -> memref<1x!tpu.dma_semaphore, #tpu.memory_space<semaphore_mem>>
    %56 = tpu.memref_squeeze %55 : memref<1x!tpu.dma_semaphore, #tpu.memory_space<semaphore_mem>> -> memref<!tpu.dma_semaphore, #tpu.memory_space<semaphore_mem>>
    tpu.enqueue_dma source(%53 : memref<1x1024xf32, #tpu.memory_space<any>>) target(%54 : memref<1x1024xf32, #tpu.memory_space<any>>) target_semaphore(%56 : memref<!tpu.dma_semaphore, #tpu.memory_space<semaphore_mem>>)
    %c0_i32_28 = arith.constant 0 : i32
    %57 = arith.addi %0, %c0_i32_28 : i32
    %c7_i32 = arith.constant 7 : i32
    %58 = arith.addi %57, %c7_i32 : i32
    %59 = arith.index_cast %58 : i32 to index
    %60 = memref.load %arg1[%59] : memref<16xi32, #tpu.memory_space<smem>>
    %c0_i32_29 = arith.constant 0 : i32
    %c0_i32_30 = arith.constant 0 : i32
    %61 = tpu.memref_slice %arg2[%60, %c0_i32_30] : memref<64x1024xf32, #tpu.memory_space<any>> -> memref<1x1024xf32, #tpu.memory_space<any>>
    %c0_i32_31 = arith.constant 0 : i32
    %62 = tpu.memref_slice %arg3[%58, %c0_i32_31] : memref<16x1024xf32, #tpu.memory_space<any>> -> memref<1x1024xf32, #tpu.memory_space<any>>
    %63 = tpu.memref_slice %arg4[%c0_i32_29] : memref<2x!tpu.dma_semaphore, #tpu.memory_space<semaphore_mem>> -> memref<1x!tpu.dma_semaphore, #tpu.memory_space<semaphore_mem>>
    %64 = tpu.memref_squeeze %63 : memref<1x!tpu.dma_semaphore, #tpu.memory_space<semaphore_mem>> -> memref<!tpu.dma_semaphore, #tpu.memory_space<semaphore_mem>>
    tpu.enqueue_dma source(%61 : memref<1x1024xf32, #tpu.memory_space<any>>) target(%62 : memref<1x1024xf32, #tpu.memory_space<any>>) target_semaphore(%64 : memref<!tpu.dma_semaphore, #tpu.memory_space<semaphore_mem>>)
    %c0_i32_32 = arith.constant 0 : i32
    %65 = arith.addi %0, %c0_i32_32 : i32
    %c8_i32 = arith.constant 8 : i32
    %66 = arith.addi %65, %c8_i32 : i32
    %67 = arith.index_cast %66 : i32 to index
    %68 = memref.load %arg1[%67] : memref<16xi32, #tpu.memory_space<smem>>
    %c0_i32_33 = arith.constant 0 : i32
    %c0_i32_34 = arith.constant 0 : i32
    %69 = tpu.memref_slice %arg2[%68, %c0_i32_34] : memref<64x1024xf32, #tpu.memory_space<any>> -> memref<1x1024xf32, #tpu.memory_space<any>>
    %c0_i32_35 = arith.constant 0 : i32
    %70 = tpu.memref_slice %arg3[%66, %c0_i32_35] : memref<16x1024xf32, #tpu.memory_space<any>> -> memref<1x1024xf32, #tpu.memory_space<any>>
    %71 = tpu.memref_slice %arg4[%c0_i32_33] : memref<2x!tpu.dma_semaphore, #tpu.memory_space<semaphore_mem>> -> memref<1x!tpu.dma_semaphore, #tpu.memory_space<semaphore_mem>>
    %72 = tpu.memref_squeeze %71 : memref<1x!tpu.dma_semaphore, #tpu.memory_space<semaphore_mem>> -> memref<!tpu.dma_semaphore, #tpu.memory_space<semaphore_mem>>
    tpu.enqueue_dma source(%69 : memref<1x1024xf32, #tpu.memory_space<any>>) target(%70 : memref<1x1024xf32, #tpu.memory_space<any>>) target_semaphore(%72 : memref<!tpu.dma_semaphore, #tpu.memory_space<semaphore_mem>>)
    %c0_i32_36 = arith.constant 0 : i32
    %73 = arith.addi %0, %c0_i32_36 : i32
    %c9_i32 = arith.constant 9 : i32
    %74 = arith.addi %73, %c9_i32 : i32
    %75 = arith.index_cast %74 : i32 to index
    %76 = memref.load %arg1[%75] : memref<16xi32, #tpu.memory_space<smem>>
    %c0_i32_37 = arith.constant 0 : i32
    %c0_i32_38 = arith.constant 0 : i32
    %77 = tpu.memref_slice %arg2[%76, %c0_i32_38] : memref<64x1024xf32, #tpu.memory_space<any>> -> memref<1x1024xf32, #tpu.memory_space<any>>
    %c0_i32_39 = arith.constant 0 : i32
    %78 = tpu.memref_slice %arg3[%74, %c0_i32_39] : memref<16x1024xf32, #tpu.memory_space<any>> -> memref<1x1024xf32, #tpu.memory_space<any>>
    %79 = tpu.memref_slice %arg4[%c0_i32_37] : memref<2x!tpu.dma_semaphore, #tpu.memory_space<semaphore_mem>> -> memref<1x!tpu.dma_semaphore, #tpu.memory_space<semaphore_mem>>
    %80 = tpu.memref_squeeze %79 : memref<1x!tpu.dma_semaphore, #tpu.memory_space<semaphore_mem>> -> memref<!tpu.dma_semaphore, #tpu.memory_space<semaphore_mem>>
    tpu.enqueue_dma source(%77 : memref<1x1024xf32, #tpu.memory_space<any>>) target(%78 : memref<1x1024xf32, #tpu.memory_space<any>>) target_semaphore(%80 : memref<!tpu.dma_semaphore, #tpu.memory_space<semaphore_mem>>)
    %c0_i32_40 = arith.constant 0 : i32
    %81 = arith.addi %0, %c0_i32_40 : i32
    %c10_i32 = arith.constant 10 : i32
    %82 = arith.addi %81, %c10_i32 : i32
    %83 = arith.index_cast %82 : i32 to index
    %84 = memref.load %arg1[%83] : memref<16xi32, #tpu.memory_space<smem>>
    %c0_i32_41 = arith.constant 0 : i32
    %c0_i32_42 = arith.constant 0 : i32
    %85 = tpu.memref_slice %arg2[%84, %c0_i32_42] : memref<64x1024xf32, #tpu.memory_space<any>> -> memref<1x1024xf32, #tpu.memory_space<any>>
    %c0_i32_43 = arith.constant 0 : i32
    %86 = tpu.memref_slice %arg3[%82, %c0_i32_43] : memref<16x1024xf32, #tpu.memory_space<any>> -> memref<1x1024xf32, #tpu.memory_space<any>>
    %87 = tpu.memref_slice %arg4[%c0_i32_41] : memref<2x!tpu.dma_semaphore, #tpu.memory_space<semaphore_mem>> -> memref<1x!tpu.dma_semaphore, #tpu.memory_space<semaphore_mem>>
    %88 = tpu.memref_squeeze %87 : memref<1x!tpu.dma_semaphore, #tpu.memory_space<semaphore_mem>> -> memref<!tpu.dma_semaphore, #tpu.memory_space<semaphore_mem>>
    tpu.enqueue_dma source(%85 : memref<1x1024xf32, #tpu.memory_space<any>>) target(%86 : memref<1x1024xf32, #tpu.memory_space<any>>) target_semaphore(%88 : memref<!tpu.dma_semaphore, #tpu.memory_space<semaphore_mem>>)
    %c0_i32_44 = arith.constant 0 : i32
    %89 = arith.addi %0, %c0_i32_44 : i32
    %c11_i32 = arith.constant 11 : i32
    %90 = arith.addi %89, %c11_i32 : i32
    %91 = arith.index_cast %90 : i32 to index
    %92 = memref.load %arg1[%91] : memref<16xi32, #tpu.memory_space<smem>>
    %c0_i32_45 = arith.constant 0 : i32
    %c0_i32_46 = arith.constant 0 : i32
    %93 = tpu.memref_slice %arg2[%92, %c0_i32_46] : memref<64x1024xf32, #tpu.memory_space<any>> -> memref<1x1024xf32, #tpu.memory_space<any>>
    %c0_i32_47 = arith.constant 0 : i32
    %94 = tpu.memref_slice %arg3[%90, %c0_i32_47] : memref<16x1024xf32, #tpu.memory_space<any>> -> memref<1x1024xf32, #tpu.memory_space<any>>
    %95 = tpu.memref_slice %arg4[%c0_i32_45] : memref<2x!tpu.dma_semaphore, #tpu.memory_space<semaphore_mem>> -> memref<1x!tpu.dma_semaphore, #tpu.memory_space<semaphore_mem>>
    %96 = tpu.memref_squeeze %95 : memref<1x!tpu.dma_semaphore, #tpu.memory_space<semaphore_mem>> -> memref<!tpu.dma_semaphore, #tpu.memory_space<semaphore_mem>>
    tpu.enqueue_dma source(%93 : memref<1x1024xf32, #tpu.memory_space<any>>) target(%94 : memref<1x1024xf32, #tpu.memory_space<any>>) target_semaphore(%96 : memref<!tpu.dma_semaphore, #tpu.memory_space<semaphore_mem>>)
    %c0_i32_48 = arith.constant 0 : i32
    %97 = arith.addi %0, %c0_i32_48 : i32
    %c12_i32 = arith.constant 12 : i32
    %98 = arith.addi %97, %c12_i32 : i32
    %99 = arith.index_cast %98 : i32 to index
    %100 = memref.load %arg1[%99] : memref<16xi32, #tpu.memory_space<smem>>
    %c0_i32_49 = arith.constant 0 : i32
    %c0_i32_50 = arith.constant 0 : i32
    %101 = tpu.memref_slice %arg2[%100, %c0_i32_50] : memref<64x1024xf32, #tpu.memory_space<any>> -> memref<1x1024xf32, #tpu.memory_space<any>>
    %c0_i32_51 = arith.constant 0 : i32
    %102 = tpu.memref_slice %arg3[%98, %c0_i32_51] : memref<16x1024xf32, #tpu.memory_space<any>> -> memref<1x1024xf32, #tpu.memory_space<any>>
    %103 = tpu.memref_slice %arg4[%c0_i32_49] : memref<2x!tpu.dma_semaphore, #tpu.memory_space<semaphore_mem>> -> memref<1x!tpu.dma_semaphore, #tpu.memory_space<semaphore_mem>>
    %104 = tpu.memref_squeeze %103 : memref<1x!tpu.dma_semaphore, #tpu.memory_space<semaphore_mem>> -> memref<!tpu.dma_semaphore, #tpu.memory_space<semaphore_mem>>
    tpu.enqueue_dma source(%101 : memref<1x1024xf32, #tpu.memory_space<any>>) target(%102 : memref<1x1024xf32, #tpu.memory_space<any>>) target_semaphore(%104 : memref<!tpu.dma_semaphore, #tpu.memory_space<semaphore_mem>>)
    %c0_i32_52 = arith.constant 0 : i32
    %105 = arith.addi %0, %c0_i32_52 : i32
    %c13_i32 = arith.constant 13 : i32
    %106 = arith.addi %105, %c13_i32 : i32
    %107 = arith.index_cast %106 : i32 to index
    %108 = memref.load %arg1[%107] : memref<16xi32, #tpu.memory_space<smem>>
    %c0_i32_53 = arith.constant 0 : i32
    %c0_i32_54 = arith.constant 0 : i32
    %109 = tpu.memref_slice %arg2[%108, %c0_i32_54] : memref<64x1024xf32, #tpu.memory_space<any>> -> memref<1x1024xf32, #tpu.memory_space<any>>
    %c0_i32_55 = arith.constant 0 : i32
    %110 = tpu.memref_slice %arg3[%106, %c0_i32_55] : memref<16x1024xf32, #tpu.memory_space<any>> -> memref<1x1024xf32, #tpu.memory_space<any>>
    %111 = tpu.memref_slice %arg4[%c0_i32_53] : memref<2x!tpu.dma_semaphore, #tpu.memory_space<semaphore_mem>> -> memref<1x!tpu.dma_semaphore, #tpu.memory_space<semaphore_mem>>
    %112 = tpu.memref_squeeze %111 : memref<1x!tpu.dma_semaphore, #tpu.memory_space<semaphore_mem>> -> memref<!tpu.dma_semaphore, #tpu.memory_space<semaphore_mem>>
    tpu.enqueue_dma source(%109 : memref<1x1024xf32, #tpu.memory_space<any>>) target(%110 : memref<1x1024xf32, #tpu.memory_space<any>>) target_semaphore(%112 : memref<!tpu.dma_semaphore, #tpu.memory_space<semaphore_mem>>)
    %c0_i32_56 = arith.constant 0 : i32
    %113 = arith.addi %0, %c0_i32_56 : i32
    %c14_i32 = arith.constant 14 : i32
    %114 = arith.addi %113, %c14_i32 : i32
    %115 = arith.index_cast %114 : i32 to index
    %116 = memref.load %arg1[%115] : memref<16xi32, #tpu.memory_space<smem>>
    %c0_i32_57 = arith.constant 0 : i32
    %c0_i32_58 = arith.constant 0 : i32
    %117 = tpu.memref_slice %arg2[%116, %c0_i32_58] : memref<64x1024xf32, #tpu.memory_space<any>> -> memref<1x1024xf32, #tpu.memory_space<any>>
    %c0_i32_59 = arith.constant 0 : i32
    %118 = tpu.memref_slice %arg3[%114, %c0_i32_59] : memref<16x1024xf32, #tpu.memory_space<any>> -> memref<1x1024xf32, #tpu.memory_space<any>>
    %119 = tpu.memref_slice %arg4[%c0_i32_57] : memref<2x!tpu.dma_semaphore, #tpu.memory_space<semaphore_mem>> -> memref<1x!tpu.dma_semaphore, #tpu.memory_space<semaphore_mem>>
    %120 = tpu.memref_squeeze %119 : memref<1x!tpu.dma_semaphore, #tpu.memory_space<semaphore_mem>> -> memref<!tpu.dma_semaphore, #tpu.memory_space<semaphore_mem>>
    tpu.enqueue_dma source(%117 : memref<1x1024xf32, #tpu.memory_space<any>>) target(%118 : memref<1x1024xf32, #tpu.memory_space<any>>) target_semaphore(%120 : memref<!tpu.dma_semaphore, #tpu.memory_space<semaphore_mem>>)
    %c0_i32_60 = arith.constant 0 : i32
    %121 = arith.addi %0, %c0_i32_60 : i32
    %c15_i32 = arith.constant 15 : i32
    %122 = arith.addi %121, %c15_i32 : i32
    %123 = arith.index_cast %122 : i32 to index
    %124 = memref.load %arg1[%123] : memref<16xi32, #tpu.memory_space<smem>>
    %c0_i32_61 = arith.constant 0 : i32
    %c0_i32_62 = arith.constant 0 : i32
    %125 = tpu.memref_slice %arg2[%124, %c0_i32_62] : memref<64x1024xf32, #tpu.memory_space<any>> -> memref<1x1024xf32, #tpu.memory_space<any>>
    %c0_i32_63 = arith.constant 0 : i32
    %126 = tpu.memref_slice %arg3[%122, %c0_i32_63] : memref<16x1024xf32, #tpu.memory_space<any>> -> memref<1x1024xf32, #tpu.memory_space<any>>
    %127 = tpu.memref_slice %arg4[%c0_i32_61] : memref<2x!tpu.dma_semaphore, #tpu.memory_space<semaphore_mem>> -> memref<1x!tpu.dma_semaphore, #tpu.memory_space<semaphore_mem>>
    %128 = tpu.memref_squeeze %127 : memref<1x!tpu.dma_semaphore, #tpu.memory_space<semaphore_mem>> -> memref<!tpu.dma_semaphore, #tpu.memory_space<semaphore_mem>>
    tpu.enqueue_dma source(%125 : memref<1x1024xf32, #tpu.memory_space<any>>) target(%126 : memref<1x1024xf32, #tpu.memory_space<any>>) target_semaphore(%128 : memref<!tpu.dma_semaphore, #tpu.memory_space<semaphore_mem>>)
    %c0_i32_64 = arith.constant 0 : i32
    %129 = arith.addi %0, %c0_i32_64 : i32
    %c0_i32_65 = arith.constant 0 : i32
    %c0_i32_66 = arith.constant 0 : i32
    %130 = tpu.memref_slice %arg3[%129, %c0_i32_66] : memref<16x1024xf32, #tpu.memory_space<any>> -> memref<16x1024xf32, #tpu.memory_space<any>>
    %c0_i32_67 = arith.constant 0 : i32
    %131 = tpu.memref_slice %arg3[%129, %c0_i32_67] : memref<16x1024xf32, #tpu.memory_space<any>> -> memref<16x1024xf32, #tpu.memory_space<any>>
    %132 = tpu.memref_slice %arg4[%c0_i32_65] : memref<2x!tpu.dma_semaphore, #tpu.memory_space<semaphore_mem>> -> memref<1x!tpu.dma_semaphore, #tpu.memory_space<semaphore_mem>>
    %133 = tpu.memref_squeeze %132 : memref<1x!tpu.dma_semaphore, #tpu.memory_space<semaphore_mem>> -> memref<!tpu.dma_semaphore, #tpu.memory_space<semaphore_mem>>
    tpu.wait_dma2 semaphore(%133 : memref<!tpu.dma_semaphore, #tpu.memory_space<semaphore_mem>>) src(%130 : memref<16x1024xf32, #tpu.memory_space<any>>) dst(%131 : memref<16x1024xf32, #tpu.memory_space<any>>)
    return
  }
}

</mosaic_0001>

<bundles_post_ra>
// kernel: tpu_custom_call.1
= control target key start
LH: loop header
LB: loop body
LE: loop exit
PB: predicated region body
PF: predicated region fallthrough
CT: control target
= control target key end

     0   :  { %s678_s12 = smov [#allocation4]   ;;  %s893_s0 = inlined_call_operand.hbm [shape: s32[16], index: 0, kind: input, shape index: {}]   ;;  %s894_s1 = inlined_call_operand.hbm [shape: f32[64,1024], index: 1, kind: input, shape index: {}]   ;;  %s895_s2 = inlined_call_operand.hbm [shape: f32[16,1024], index: 2, kind: output, shape index: {}]  }
   0x1   :  { %s8_s11 = sshll.u32 %s893_s0, 4  ;;  %s9_s11 = int_to_ptr.hbm [resolvable:$true] %s8_s11 }
   0x2   :  { %11 = dma.hbm_to_smem %s9_s11, 16, %s678_s12, [#allocation3] }
   0x3   :  { %674 = dma.done.wait [#allocation3], 16 }
   0x4   :  { %675 = vsyncadd [#allocation3], 4294967280 }
   0x5   :  { %14 = sfence }
   0x6   :  { %s16_s13 = sld [smem:[#allocation4]]  ;;  %s33_s16 = sshll.u32 %s895_s2, 4  ;;  %s34_s16 = int_to_ptr.hbm [resolvable:$true] %s33_s16 }
   0x7   :  { %s679_s17 = smov 128   ;;  %s680_s18 = smov 1  }
   0x8   :  { %38 = sst [smem:[#allocation6]] %s679_s17  ;;  %s681_s26 = smov [#allocation2]  }
   0x9   :  { %40 = sst [smem:[#allocation6 + $0x1]] %s679_s17  ;;  %s682_s27 = smov [#allocation5]  }
   0xa   :  { %42 = sst [smem:[#allocation6 + $0x2]] %s680_s18  ;;  %s683_s28 = smov 0  }
   0xb   :  { %s56_s4 = scalar_lea.hbm %s895_s2, 1  ;;  %s684_s14 = smov [#allocation7]  }
   0xc   :  { %s17_s0 = sshrl.u32 %s16_s13, 3  ;;  %s18_s19 = sand.u32 7, %s16_s13  }
   0xd   :  { %s608_s20 = sshll.u32 %s17_s0, 6  ;;  %s63_s5 = sshll.u32 %s56_s4, 4  ;;  %s64_s5 = int_to_ptr.hbm [resolvable:$true] %s63_s5 }
   0xe   :  { %s20_s21 = sadd.s32 %s608_s20, %s18_s19  ;;  %s86_s19 = scalar_lea.hbm %s895_s2, 2 }
   0xf   :  { %s21_s24 = scalar_lea.hbm %s894_s1, %s20_s21  ;;  %s93_s20 = sshll.u32 %s86_s19, 4  ;;  %s94_s20 = int_to_ptr.hbm [resolvable:$true] %s93_s20 }
  0x10   :  { %s31_s25 = sshll.u32 %s21_s24, 4  ;;  %s685_s3 = smov [#allocation9]   ;;  %s32_s25 = int_to_ptr.hbm [resolvable:$true] %s31_s25 }
  0x11   :  { %44 = dma.general %s32_s25, 128, %s34_s16, %s681_s26, %s682_s27, [#allocation6], %s683_s28, 0  }
  0x12   :  { %s609_s29 = sld [smem:[#allocation4 + $0x1]]  ;;  %s686_s0 = smov [#allocation11]  }
  0x13   :  { %68 = sst [smem:[#allocation8]] %s679_s17 }
  0x14   :  { %70 = sst [smem:[#allocation8 + $0x1]] %s679_s17 }
  0x15   :  { %72 = sst [smem:[#allocation8 + $0x2]] %s680_s18 }
  0x18   :  { %s47_s6 = sshrl.u32 %s609_s29, 3  ;;  %s48_s7 = sand.u32 7, %s609_s29  }
  0x19   :  { %s610_s8 = sshll.u32 %s47_s6, 6  ;;  %s687_s6 = smov [#allocation13]  }
  0x1a   :  { %s50_s9 = sadd.s32 %s610_s8, %s48_s7  ;;  %s116_s7 = scalar_lea.hbm %s895_s2, 3 }
  0x1b   :  { %s51_s12 = scalar_lea.hbm %s894_s1, %s50_s9  ;;  %s123_s8 = sshll.u32 %s116_s7, 4  ;;  %s124_s8 = int_to_ptr.hbm [resolvable:$true] %s123_s8 }
  0x1c   :  { %s61_s13 = sshll.u32 %s51_s12, 4  ;;  %s62_s13 = int_to_ptr.hbm [resolvable:$true] %s61_s13 }
  0x1d   :  { %74 = dma.general %s62_s13, 128, %s64_s5, %s681_s26, %s684_s14, [#allocation8], %s683_s28, 0  }
  0x1e   :  { %s611_s15 = sld [smem:[#allocation4 + $0x2]] }
  0x1f   :  { %98 = sst [smem:[#allocation10]] %s679_s17 }
  0x20   :  { %100 = sst [smem:[#allocation10 + $0x1]] %s679_s17 }
  0x21   :  { %102 = sst [smem:[#allocation10 + $0x2]] %s680_s18 }
  0x24   :  { %s77_s21 = sshrl.u32 %s611_s15, 3  ;;  %s78_s22 = sand.u32 7, %s611_s15  }
  0x25   :  { %s612_s23 = sshll.u32 %s77_s21, 6  ;;  %s688_s21 = smov [#allocation15]  }
  0x26   :  { %s80_s24 = sadd.s32 %s612_s23, %s78_s22  ;;  %s146_s22 = scalar_lea.hbm %s895_s2, 4 }
  0x27   :  { %s81_s29 = scalar_lea.hbm %s894_s1, %s80_s24  ;;  %s153_s23 = sshll.u32 %s146_s22, 4  ;;  %s154_s23 = int_to_ptr.hbm [resolvable:$true] %s153_s23 }
  0x28   :  { %s91_s30 = sshll.u32 %s81_s29, 4  ;;  %s92_s30 = int_to_ptr.hbm [resolvable:$true] %s91_s30 }
  0x29   :  { %104 = dma.general %s92_s30, 128, %s94_s20, %s681_s26, %s685_s3, [#allocation10], %s683_s28, 0  }
  0x2a   :  { %s613_s4 = sld [smem:[#allocation4 + $0x3]] }
  0x2b   :  { %128 = sst [smem:[#allocation12]] %s679_s17 }
  0x2c   :  { %130 = sst [smem:[#allocation12 + $0x1]] %s679_s17 }
  0x2d   :  { %132 = sst [smem:[#allocation12 + $0x2]] %s680_s18 }
  0x30   :  { %s107_s9 = sshrl.u32 %s613_s4, 3  ;;  %s108_s10 = sand.u32 7, %s613_s4  }
  0x31   :  { %s614_s11 = sshll.u32 %s107_s9, 6  ;;  %s689_s9 = smov [#allocation17]  }
  0x32   :  { %s110_s12 = sadd.s32 %s614_s11, %s108_s10  ;;  %s176_s10 = scalar_lea.hbm %s895_s2, 5 }
  0x33   :  { %s111_s15 = scalar_lea.hbm %s894_s1, %s110_s12  ;;  %s183_s11 = sshll.u32 %s176_s10, 4  ;;  %s184_s11 = int_to_ptr.hbm [resolvable:$true] %s183_s11 }
  0x34   :  { %s121_s16 = sshll.u32 %s111_s15, 4  ;;  %s122_s16 = int_to_ptr.hbm [resolvable:$true] %s121_s16 }
  0x35   :  { %134 = dma.general %s122_s16, 128, %s124_s8, %s681_s26, %s686_s0, [#allocation12], %s683_s28, 0  }
  0x36   :  { %s615_s19 = sld [smem:[#allocation4 + $0x4]] }
  0x37   :  { %158 = sst [smem:[#allocation14]] %s679_s17 }
  0x38   :  { %160 = sst [smem:[#allocation14 + $0x1]] %s679_s17 }
  0x39   :  { %162 = sst [smem:[#allocation14 + $0x2]] %s680_s18 }
  0x3c   :  { %s137_s24 = sshrl.u32 %s615_s19, 3  ;;  %s138_s25 = sand.u32 7, %s615_s19  }
  0x3d   :  { %s616_s27 = sshll.u32 %s137_s24, 6  ;;  %s690_s24 = smov [#allocation19]  }
  0x3e   :  { %s140_s29 = sadd.s32 %s616_s27, %s138_s25  ;;  %s206_s25 = scalar_lea.hbm %s895_s2, 6 }
  0x3f   :  { %s141_s4 = scalar_lea.hbm %s894_s1, %s140_s29  ;;  %s213_s27 = sshll.u32 %s206_s25, 4  ;;  %s214_s27 = int_to_ptr.hbm [resolvable:$true] %s213_s27 }
  0x40   :  { %s151_s5 = sshll.u32 %s141_s4, 4  ;;  %s152_s5 = int_to_ptr.hbm [resolvable:$true] %s151_s5 }
  0x41   :  { %164 = dma.general %s152_s5, 128, %s154_s23, %s681_s26, %s687_s6, [#allocation14], %s683_s28, 0  }
  0x42   :  { %s617_s7 = sld [smem:[#allocation4 + $0x5]] }
  0x43   :  { %188 = sst [smem:[#allocation16]] %s679_s17 }
  0x44   :  { %190 = sst [smem:[#allocation16 + $0x1]] %s679_s17 }
  0x45   :  { %192 = sst [smem:[#allocation16 + $0x2]] %s680_s18 }
  0x48   :  { %s167_s12 = sshrl.u32 %s617_s7, 3  ;;  %s168_s13 = sand.u32 7, %s617_s7  }
  0x49   :  { %s618_s14 = sshll.u32 %s167_s12, 6  ;;  %s691_s12 = smov [#allocation21]  }
  0x4a   :  { %s170_s15 = sadd.s32 %s618_s14, %s168_s13  ;;  %s236_s13 = scalar_lea.hbm %s895_s2, 7 }
  0x4b   :  { %s171_s19 = scalar_lea.hbm %s894_s1, %s170_s15  ;;  %s243_s14 = sshll.u32 %s236_s13, 4  ;;  %s244_s14 = int_to_ptr.hbm [resolvable:$true] %s243_s14 }
  0x4c   :  { %s181_s20 = sshll.u32 %s171_s19, 4  ;;  %s182_s20 = int_to_ptr.hbm [resolvable:$true] %s181_s20 }
  0x4d   :  { %194 = dma.general %s182_s20, 128, %s184_s11, %s681_s26, %s688_s21, [#allocation16], %s683_s28, 0  }
  0x4e   :  { %s619_s22 = sld [smem:[#allocation4 + $0x6]] }
  0x4f   :  { %218 = sst [smem:[#allocation18]] %s679_s17 }
  0x50   :  { %220 = sst [smem:[#allocation18 + $0x1]] %s679_s17 }
  0x51   :  { %222 = sst [smem:[#allocation18 + $0x2]] %s680_s18 }
  0x54   :  { %s197_s29 = sshrl.u32 %s619_s22, 3  ;;  %s198_s30 = sand.u32 7, %s619_s22  }
  0x55   :  { %s620_s3 = sshll.u32 %s197_s29, 6  ;;  %s692_s29 = smov [#allocation23]  }
  0x56   :  { %s200_s4 = sadd.s32 %s620_s3, %s198_s30  ;;  %s266_s30 = scalar_lea.hbm %s895_s2, 64 }
  0x57   :  { %s201_s7 = scalar_lea.hbm %s894_s1, %s200_s4  ;;  %s273_s3 = sshll.u32 %s266_s30, 4  ;;  %s274_s3 = int_to_ptr.hbm [resolvable:$true] %s273_s3 }
  0x58   :  { %s211_s8 = sshll.u32 %s201_s7, 4  ;;  %s212_s8 = int_to_ptr.hbm [resolvable:$true] %s211_s8 }
  0x59   :  { %224 = dma.general %s212_s8, 128, %s214_s27, %s681_s26, %s689_s9, [#allocation18], %s683_s28, 0  }
  0x5a   :  { %s621_s10 = sld [smem:[#allocation4 + $0x7]] }
  0x5b   :  { %248 = sst [smem:[#allocation20]] %s679_s17 }
  0x5c   :  { %250 = sst [smem:[#allocation20 + $0x1]] %s679_s17 }
  0x5d   :  { %252 = sst [smem:[#allocation20 + $0x2]] %s680_s18 }
  0x60   :  { %s227_s15 = sshrl.u32 %s621_s10, 3  ;;  %s228_s16 = sand.u32 7, %s621_s10  }
  0x61   :  { %s622_s0 = sshll.u32 %s227_s15, 6  ;;  %s693_s15 = smov [#allocation25]  }
  0x62   :  { %s230_s19 = sadd.s32 %s622_s0, %s228_s16  ;;  %s296_s16 = scalar_lea.hbm %s895_s2, 65 }
  0x63   :  { %s231_s22 = scalar_lea.hbm %s894_s1, %s230_s19  ;;  %s303_s0 = sshll.u32 %s296_s16, 4  ;;  %s304_s0 = int_to_ptr.hbm [resolvable:$true] %s303_s0 }
  0x64   :  { %s241_s23 = sshll.u32 %s231_s22, 4  ;;  %s242_s23 = int_to_ptr.hbm [resolvable:$true] %s241_s23 }
  0x65   :  { %254 = dma.general %s242_s23, 128, %s244_s14, %s681_s26, %s690_s24, [#allocation20], %s683_s28, 0  }
  0x66   :  { %s623_s25 = sld [smem:[#allocation4 + $0x8]] }
  0x67   :  { %278 = sst [smem:[#allocation22]] %s679_s17 }
  0x68   :  { %280 = sst [smem:[#allocation22 + $0x1]] %s679_s17 }
  0x69   :  { %282 = sst [smem:[#allocation22 + $0x2]] %s680_s18 }
  0x6c   :  { %s257_s4 = sshrl.u32 %s623_s25, 3  ;;  %s258_s5 = sand.u32 7, %s623_s25  }
  0x6d   :  { %s624_s6 = sshll.u32 %s257_s4, 6  ;;  %s694_s4 = smov [#allocation27]  }
  0x6e   :  { %s260_s7 = sadd.s32 %s624_s6, %s258_s5  ;;  %s326_s5 = scalar_lea.hbm %s895_s2, 66 }
  0x6f   :  { %s261_s10 = scalar_lea.hbm %s894_s1, %s260_s7  ;;  %s333_s6 = sshll.u32 %s326_s5, 4  ;;  %s334_s6 = int_to_ptr.hbm [resolvable:$true] %s333_s6 }
  0x70   :  { %s271_s11 = sshll.u32 %s261_s10, 4  ;;  %s272_s11 = int_to_ptr.hbm [resolvable:$true] %s271_s11 }
  0x71   :  { %284 = dma.general %s272_s11, 128, %s274_s3, %s681_s26, %s691_s12, [#allocation22], %s683_s28, 0  }
  0x72   :  { %s625_s13 = sld [smem:[#allocation4 + $0x9]] }
  0x73   :  { %308 = sst [smem:[#allocation24]] %s679_s17 }
  0x74   :  { %310 = sst [smem:[#allocation24 + $0x1]] %s679_s17 }
  0x75   :  { %312 = sst [smem:[#allocation24 + $0x2]] %s680_s18 }
  0x78   :  { %s287_s19 = sshrl.u32 %s625_s13, 3  ;;  %s288_s20 = sand.u32 7, %s625_s13  }
  0x79   :  { %s626_s21 = sshll.u32 %s287_s19, 6  ;;  %s695_s19 = smov [#allocation29]  }
  0x7a   :  { %s290_s22 = sadd.s32 %s626_s21, %s288_s20  ;;  %s356_s20 = scalar_lea.hbm %s895_s2, 67 }
  0x7b   :  { %s291_s25 = scalar_lea.hbm %s894_s1, %s290_s22  ;;  %s363_s21 = sshll.u32 %s356_s20, 4  ;;  %s364_s21 = int_to_ptr.hbm [resolvable:$true] %s363_s21 }
  0x7c   :  { %s301_s27 = sshll.u32 %s291_s25, 4  ;;  %s302_s27 = int_to_ptr.hbm [resolvable:$true] %s301_s27 }
  0x7d   :  { %314 = dma.general %s302_s27, 128, %s304_s0, %s681_s26, %s692_s29, [#allocation24], %s683_s28, 0  }
  0x7e   :  { %s627_s30 = sld [smem:[#allocation4 + $0xa]] }
  0x7f   :  { %338 = sst [smem:[#allocation26]] %s679_s17 }
  0x80   :  { %340 = sst [smem:[#allocation26 + $0x1]] %s679_s17 }
  0x81   :  { %342 = sst [smem:[#allocation26 + $0x2]] %s680_s18 }
  0x84   :  { %s317_s7 = sshrl.u32 %s627_s30, 3  ;;  %s318_s8 = sand.u32 7, %s627_s30  }
  0x85   :  { %s628_s9 = sshll.u32 %s317_s7, 6  ;;  %s696_s7 = smov [#allocation31]  }
  0x86   :  { %s320_s10 = sadd.s32 %s628_s9, %s318_s8  ;;  %s386_s8 = scalar_lea.hbm %s895_s2, 68 }
  0x87   :  { %s321_s13 = scalar_lea.hbm %s894_s1, %s320_s10  ;;  %s393_s9 = sshll.u32 %s386_s8, 4  ;;  %s394_s9 = int_to_ptr.hbm [resolvable:$true] %s393_s9 }
  0x88   :  { %s331_s14 = sshll.u32 %s321_s13, 4  ;;  %s332_s14 = int_to_ptr.hbm [resolvable:$true] %s331_s14 }
  0x89   :  { %344 = dma.general %s332_s14, 128, %s334_s6, %s681_s26, %s693_s15, [#allocation26], %s683_s28, 0  }
  0x8a   :  { %s629_s16 = sld [smem:[#allocation4 + $0xb]] }
  0x8b   :  { %368 = sst [smem:[#allocation28]] %s679_s17 }
  0x8c   :  { %370 = sst [smem:[#allocation28 + $0x1]] %s679_s17 }
  0x8d   :  { %372 = sst [smem:[#allocation28 + $0x2]] %s680_s18 }
  0x90   :  { %s347_s22 = sshrl.u32 %s629_s16, 3  ;;  %s348_s23 = sand.u32 7, %s629_s16  }
  0x91   :  { %s630_s24 = sshll.u32 %s347_s22, 6  ;;  %s697_s22 = smov [#allocation33]  }
  0x92   :  { %s350_s25 = sadd.s32 %s630_s24, %s348_s23  ;;  %s416_s23 = scalar_lea.hbm %s895_s2, 69 }
  0x93   :  { %s351_s30 = scalar_lea.hbm %s894_s1, %s350_s25  ;;  %s423_s24 = sshll.u32 %s416_s23, 4  ;;  %s424_s24 = int_to_ptr.hbm [resolvable:$true] %s423_s24 }
  0x94   :  { %s361_s3 = sshll.u32 %s351_s30, 4  ;;  %s362_s3 = int_to_ptr.hbm [resolvable:$true] %s361_s3 }
  0x95   :  { %374 = dma.general %s362_s3, 128, %s364_s21, %s681_s26, %s694_s4, [#allocation28], %s683_s28, 0  }
  0x96   :  { %s631_s5 = sld [smem:[#allocation4 + $0xc]] }
  0x97   :  { %398 = sst [smem:[#allocation30]] %s679_s17 }
  0x98   :  { %400 = sst [smem:[#allocation30 + $0x1]] %s679_s17 }
  0x99   :  { %402 = sst [smem:[#allocation30 + $0x2]] %s680_s18 }
  0x9c   :  { %s377_s10 = sshrl.u32 %s631_s5, 3  ;;  %s378_s11 = sand.u32 7, %s631_s5  }
  0x9d   :  { %s632_s12 = sshll.u32 %s377_s10, 6  ;;  %s698_s10 = smov [#allocation35]  }
  0x9e   :  { %s380_s13 = sadd.s32 %s632_s12, %s378_s11  ;;  %s446_s11 = scalar_lea.hbm %s895_s2, 70 }
  0x9f   :  { %s381_s16 = scalar_lea.hbm %s894_s1, %s380_s13  ;;  %s453_s12 = sshll.u32 %s446_s11, 4  ;;  %s454_s12 = int_to_ptr.hbm [resolvable:$true] %s453_s12 }
  0xa0   :  { %s391_s0 = sshll.u32 %s381_s16, 4  ;;  %s392_s0 = int_to_ptr.hbm [resolvable:$true] %s391_s0 }
  0xa1   :  { %404 = dma.general %s392_s0, 128, %s394_s9, %s681_s26, %s695_s19, [#allocation30], %s683_s28, 0  }
  0xa2   :  { %s633_s20 = sld [smem:[#allocation4 + $0xd]] }
  0xa3   :  { %428 = sst [smem:[#allocation32]] %s679_s17 }
  0xa4   :  { %430 = sst [smem:[#allocation32 + $0x1]] %s679_s17 }
  0xa5   :  { %432 = sst [smem:[#allocation32 + $0x2]] %s680_s18 }
  0xa8   :  { %s407_s25 = sshrl.u32 %s633_s20, 3  ;;  %s408_s27 = sand.u32 7, %s633_s20  }
  0xa9   :  { %s634_s29 = sshll.u32 %s407_s25, 6 }
  0xaa   :  { %s410_s30 = sadd.s32 %s634_s29, %s408_s27  ;;  %s476_s27 = scalar_lea.hbm %s895_s2, 71 }
  0xab   :  { %s411_s5 = scalar_lea.hbm %s894_s1, %s410_s30  ;;  %s483_s29 = sshll.u32 %s476_s27, 4  ;;  %s484_s29 = int_to_ptr.hbm [resolvable:$true] %s483_s29 }
  0xac   :  { %s421_s6 = sshll.u32 %s411_s5, 4  ;;  %s422_s6 = int_to_ptr.hbm [resolvable:$true] %s421_s6 }
  0xad   :  { %434 = dma.general %s422_s6, 128, %s424_s24, %s681_s26, %s696_s7, [#allocation32], %s683_s28, 0  }
  0xae   :  { %s635_s8 = sld [smem:[#allocation4 + $0xe]] }
  0xaf   :  { %458 = sst [smem:[#allocation34]] %s679_s17 }
  0xb0   :  { %460 = sst [smem:[#allocation34 + $0x1]] %s679_s17 }
  0xb1   :  { %462 = sst [smem:[#allocation34 + $0x2]] %s680_s18 }
  0xb4   :  { %s437_s13 = sshrl.u32 %s635_s8, 3  ;;  %s438_s14 = sand.u32 7, %s635_s8  }
  0xb5   :  { %s636_s15 = sshll.u32 %s437_s13, 6 }
  0xb6   :  { %s440_s16 = sadd.s32 %s636_s15, %s438_s14 }
  0xb7   :  { %s441_s20 = scalar_lea.hbm %s894_s1, %s440_s16 }
  0xb8   :  { %s451_s21 = sshll.u32 %s441_s20, 4  ;;  %s452_s21 = int_to_ptr.hbm [resolvable:$true] %s451_s21 }
  0xb9   :  { %464 = dma.general %s452_s21, 128, %s454_s12, %s681_s26, %s697_s22, [#allocation34], %s683_s28, 0  }
  0xba   :  { %s637_s23 = sld [smem:[#allocation4 + $0xf]] }
  0xbb   :  { %488 = sst [smem:[#allocation36]] %s679_s17 }
  0xbc   :  { %490 = sst [smem:[#allocation36 + $0x1]] %s679_s17 }
  0xbd   :  { %492 = sst [smem:[#allocation36 + $0x2]] %s680_s18 }
  0xc0   :  { %s467_s30 = sshrl.u32 %s637_s23, 3  ;;  %s468_s3 = sand.u32 7, %s637_s23  }
  0xc1   :  { %s638_s4 = sshll.u32 %s467_s30, 6 }
  0xc2   :  { %s470_s5 = sadd.s32 %s638_s4, %s468_s3 }
  0xc3   :  { %s471_s8 = scalar_lea.hbm %s894_s1, %s470_s5 }
  0xc4   :  { %s481_s9 = sshll.u32 %s471_s8, 4  ;;  %s482_s9 = int_to_ptr.hbm [resolvable:$true] %s481_s9 }
  0xc5   :  { %494 = dma.general %s482_s9, 128, %s484_s29, %s681_s26, %s698_s10, [#allocation36], %s683_s28, 0  }
  0xc6   :  { %676 = dma.done.wait [#allocation2], 2048 }
  0xc7   :  { %677 = vsyncadd [#allocation2], 4294965248 }
  0xc8   :  { %499 = vsyncmov [#allocation2] }
  0xcb   :  { %s500_s2 = vpop.sfrf %499 }
  0xcc   :  { %p639_p0 = scmp.ne.s32.totalorder %s500_s2, 0 }
  0xce   :  { %504 = shalt.err (%p639_p0)  }
  0xcf   :  { %506 = vsyncmov [#allocation2 + $0x1] }
  0xd2   :  { %s507_s17 = vpop.sfrf %506 }
  0xd3   :  { %p640_p1 = scmp.ne.s32.totalorder %s507_s17, 0 }
  0xd5   :  { %511 = shalt.err (%p640_p1)  }

</bundles_post_ra>
